<compile_context>
chip_gen: v5e
topology: v5e:2x2
jax: 0.10.0
libtpu: 0.0.40
codegen_flags: <defaults>
</compile_context>

<pallas_src>
import math

import jax
import jax.numpy as jnp
from jax.experimental import pallas as pl
from jax.experimental.pallas import tpu as pltpu

EPS = 1e-7
_LOG_EPS = math.log(EPS)
_LOG_1M_EPS = math.log(1.0 - EPS)


def _make_focal_kernel(n_rows, tile_n, gamma):
    def kernel(x_ref, t_ref, w_ref, o_ref):
        x = x_ref[...]                           # (tile_n, C) input dtype
        t = t_ref[...]                           # (tile_n, 1) int32
        w = w_ref[...]                           # (1, C) f32

        # one-hot of the target class via iota compare (no gather needed)
        cls = jax.lax.broadcasted_iota(jnp.int32, x.shape, 1)
        onehot = cls == t                        # (tile_n, C) bool

        # Row max / target-class gathers stay in the input dtype (max and a
        # single-survivor masked sum are exact), so a bf16 input never
        # materializes a full f32 copy of the tile.
        m = jnp.max(x, axis=-1, keepdims=True).astype(jnp.float32)        # (tile_n, 1)
        x_t = jnp.sum(jnp.where(onehot, x, jnp.array(0, x.dtype)),
                      axis=-1, keepdims=True).astype(jnp.float32)         # (tile_n, 1)
        w_t = jnp.sum(jnp.where(onehot, w, 0.0), axis=-1, keepdims=True)  # (tile_n, 1)

        # log-sum-exp over the class (lane) axis; exp + accumulation in f32.
        s = jnp.sum(jnp.exp(x.astype(jnp.float32) - m), axis=-1, keepdims=True)

        # log(p_t); clamping p to [eps, 1-eps] == clamping log(p) (monotone)
        log_p = jnp.clip((x_t - m) - jnp.log(s), _LOG_EPS, _LOG_1M_EPS)
        p = jnp.exp(log_p)                                      # one exp per row

        one_minus_p = 1.0 - p
        if gamma == 2.0:                  # fast path: plain VPU square
            focal = one_minus_p * one_minus_p
        else:
            focal = one_minus_p ** gamma
        loss_rows = -log_p * focal * w_t                        # (tile_n, 1)

        # mask rows past the true batch size (remainder tile) BEFORE the sum
        row = jax.lax.broadcasted_iota(jnp.int32, (tile_n, 1), 0)
        valid = pl.program_id(0) * tile_n + row < n_rows
        partial = jnp.sum(jnp.where(valid, loss_rows, 0.0))

        # lane-aligned (1, 128) per-tile partial; lane 0 carries the value
        lane = jax.lax.broadcasted_iota(jnp.int32, (1, 128), 1)
        o_ref[...] = jnp.where(lane == 0, partial, 0.0)

    return kernel


def _vmem_capacity_bytes():
    """Physical per-core VMEM (trace-time query; conservative fallback)."""
    try:
        cap = getattr(pltpu.get_tpu_info(), "vmem_capacity_bytes", None)
        if cap:
            return int(cap)
    except Exception:
        pass
    return 64 * 1024 * 1024  # v7x per-TensorCore VMEM -- smallest in the fleet


def _vmem_limit_bytes():
    """Explicit scoped-VMEM limit: well above the 16/32 MiB defaults (v5e/v6e)
    so large streaming blocks compile everywhere, with headroom below the
    physical capacity (128 MiB on v5e/v6e, 64 MiB on v7x)."""
    cap = _vmem_capacity_bytes()
    return int(min(cap - (4 << 20), 100 << 20))


def _pick_tile_n(n, c, dtype, vmem_limit):
    """Largest batch tile whose accounted VMEM footprint fits the budget.

    Accounted bytes per tile row:
      * double-buffered logits block                      : 2 * C * itemsize
      * in-kernel f32 temporaries (~4 tile-wide
        intermediates: iota / onehot selects / x-m / exp) : 4 * C * 4
      * double-buffered (tile_n, 1) int32 target block,
        lane-padded to 128 lanes in VMEM                  : 2 * 512
    The budget is capped so a tile sized on a 128 MiB chip still fits v7x's
    64 MiB VMEM; rows are capped at 8192 to bound per-step vreg pressure.
    """
    row_align = 16 if dtype == jnp.bfloat16 else 8
    itemsize = jnp.dtype(dtype).itemsize
    budget = min(int(vmem_limit * 0.7), 48 * 1024 * 1024)
    bytes_per_row = 2 * c * itemsize + 4 * c * 4 + 2 * 512
    rows = budget // max(1, bytes_per_row)
    tile = max(row_align, (int(rows) // row_align) * row_align)
    tile = min(tile, 8192)
    return min(tile, n)                            # block == full dim is legal


def focal_loss(logits, target, weight, *, gamma=2.0, tile_n=None):
    """logits: (N, C), target: (N,) int, weight: (C,) -> scalar f32 loss."""
    N, C = logits.shape
    row_align = 16 if logits.dtype == jnp.bfloat16 else 8
    vmem_limit = _vmem_limit_bytes()
    if tile_n is None:
        tile_n = _pick_tile_n(N, C, logits.dtype, vmem_limit)
    tile_n = min(int(tile_n), N)
    if tile_n != N:
        # interior tiles must respect sublane alignment (8 f32 / 16 bf16 rows)
        tile_n = max(row_align, (tile_n // row_align) * row_align)
        tile_n = min(tile_n, N)
    num_tiles = (N + tile_n - 1) // tile_n

    t2d = target.astype(jnp.int32).reshape(N, 1)
    w2d = weight.astype(jnp.float32).reshape(1, C)

    partials = pl.pallas_call(
        _make_focal_kernel(N, tile_n, float(gamma)),
        out_shape=jax.ShapeDtypeStruct((1, num_tiles * 128), jnp.float32),
        grid_spec=pltpu.PrefetchScalarGridSpec(
            num_scalar_prefetch=0,
            grid=(num_tiles,),
            in_specs=[
                pl.BlockSpec((tile_n, C), lambda i: (i, 0)),   # logits tile
                pl.BlockSpec((tile_n, 1), lambda i: (i, 0)),   # target tile
                pl.BlockSpec((1, C), lambda i: (0, 0)),        # class weights
            ],
            out_specs=pl.BlockSpec((1, 128), lambda i: (0, i)),  # per-tile partial
        ),
        compiler_params=pltpu.CompilerParams(
            # disjoint per-tile output blocks -> safe to shard across TCs (v7x)
            dimension_semantics=("parallel",),
            # raise the scoped-VMEM limit explicitly so the big streaming
            # blocks compile on every generation (v5e default is only 16 MiB)
            vmem_limit_bytes=vmem_limit,
        ),
    )(logits, t2d, w2d)

    # tiny final reduction over per-tile partials + mean over batch: pure glue
    return jnp.sum(partials) / jnp.float32(N)


def focal_loss_reference(logits, target, weight, gamma=2.0):
    """Pure-JAX reference mirroring the PyTorch module."""
    C = logits.shape[-1]
    y = jax.nn.one_hot(target, C, dtype=jnp.float32)
    p = jax.nn.softmax(logits.astype(jnp.float32), axis=-1)
    p = jnp.clip(p, EPS, 1.0 - EPS)
    loss = -y * jnp.log(p)
    loss = loss * (1.0 - p) ** gamma
    loss = loss * weight.astype(jnp.float32)
    return loss.sum() / logits.shape[0]


if __name__ == "__main__":
    key = jax.random.PRNGKey(0)
    k1, k2, k3 = jax.random.split(key, 3)

    N, C = 40, 16  # small demo shapes; N chosen so the tiled run has a remainder
    logits = jax.random.normal(k1, (N, C), dtype=jnp.float32)
    target = jax.random.randint(k2, (N,), 0, C, dtype=jnp.int32)
    weight = jax.random.uniform(k3, (C,), dtype=jnp.float32, minval=0.5, maxval=1.5)

    ref = focal_loss_reference(logits, target, weight)

    # auto tile (single full tile)
    out = focal_loss(logits, target, weight)
    jax.block_until_ready(out)
    assert jnp.allclose(out, ref, rtol=1e-5, atol=1e-6), (out, ref)

    # forced small tile: grid of 3 with a masked remainder tile
    out_tiled = focal_loss(logits, target, weight, tile_n=16)
    jax.block_until_ready(out_tiled)
    assert jnp.allclose(out_tiled, ref, rtol=1e-5, atol=1e-6), (out_tiled, ref)

    print("KERNEL_OK")
</pallas_src>

<mosaic_0001>
module attributes {stable_mosaic.version = 11 : i64} {
  func.func @kernel(%arg0: i32, %arg1: memref<40x16xf32, #tpu.memory_space<vmem>>, %arg2: memref<40x1xi32, #tpu.memory_space<vmem>>, %arg3: memref<1x16xf32, #tpu.memory_space<vmem>>, %arg4: memref<1x128xf32, #tpu.memory_space<vmem>>) attributes {dimension_semantics = [#tpu.dimension_semantics<parallel>], iteration_bounds = array<i64: 1>, scalar_prefetch = 0 : i64, scratch_operands = 0 : i64, tpu.core_type = #tpu.core_type<tc>, window_params = [{transform_indices = @transform_0, window_bounds = array<i64: 40, 16>}, {transform_indices = @transform_1, window_bounds = array<i64: 40, 1>}, {pipeline_mode = #tpu.pipeline_mode<synchronous>, transform_indices = @transform_2, window_bounds = array<i64: 1, 16>}, {transform_indices = @transform_3, window_bounds = array<i64: 1, 128>}]} {
    %c0 = arith.constant 0 : index
    %c0_0 = arith.constant 0 : index
    %0 = vector.load %arg1[%c0, %c0_0] : memref<40x16xf32, #tpu.memory_space<vmem>>, vector<40x16xf32>
    %c0_1 = arith.constant 0 : index
    %c0_2 = arith.constant 0 : index
    %1 = vector.load %arg2[%c0_1, %c0_2] : memref<40x1xi32, #tpu.memory_space<vmem>>, vector<40x1xi32>
    %c0_3 = arith.constant 0 : index
    %c0_4 = arith.constant 0 : index
    %2 = vector.load %arg3[%c0_3, %c0_4] : memref<1x16xf32, #tpu.memory_space<vmem>>, vector<1x16xf32>
    %3 = tpu.iota {dimensions = array<i32: 1>} : vector<40x16xi32>
    %4 = vector.broadcast %1 : vector<40x1xi32> to vector<40x16xi32>
    %5 = arith.cmpi eq, %3, %4 : vector<40x16xi32>
    %cst = arith.constant dense<0xFF800000> : vector<40xf32>
    %6 = vector.multi_reduction <maximumf>, %0, %cst [1] : vector<40x16xf32> to vector<40xf32>
    %7 = vector.shape_cast %6 : vector<40xf32> to vector<40x1xf32>
    %cst_5 = arith.constant 0.000000e+00 : f32
    %8 = vector.broadcast %cst_5 : f32 to vector<40x16xf32>
    %9 = arith.select %5, %0, %8 : vector<40x16xi1>, vector<40x16xf32>
    %cst_6 = arith.constant dense<0.000000e+00> : vector<40xf32>
    %10 = vector.multi_reduction <add>, %9, %cst_6 [1] : vector<40x16xf32> to vector<40xf32>
    %11 = vector.shape_cast %10 : vector<40xf32> to vector<40x1xf32>
    %cst_7 = arith.constant 0.000000e+00 : f32
    %12 = vector.shape_cast %2 : vector<1x16xf32> to vector<1x16xf32>
    %13 = vector.broadcast %12 : vector<1x16xf32> to vector<40x16xf32>
    %14 = vector.broadcast %cst_7 : f32 to vector<40x16xf32>
    %15 = arith.select %5, %13, %14 : vector<40x16xi1>, vector<40x16xf32>
    %cst_8 = arith.constant dense<0.000000e+00> : vector<40xf32>
    %16 = vector.multi_reduction <add>, %15, %cst_8 [1] : vector<40x16xf32> to vector<40xf32>
    %17 = vector.shape_cast %16 : vector<40xf32> to vector<40x1xf32>
    %18 = vector.broadcast %7 : vector<40x1xf32> to vector<40x16xf32>
    %19 = arith.subf %0, %18 : vector<40x16xf32>
    %20 = math.exp %19 : vector<40x16xf32>
    %cst_9 = arith.constant dense<0.000000e+00> : vector<40xf32>
    %21 = vector.multi_reduction <add>, %20, %cst_9 [1] : vector<40x16xf32> to vector<40xf32>
    %22 = vector.shape_cast %21 : vector<40xf32> to vector<40x1xf32>
    %23 = arith.subf %11, %7 : vector<40x1xf32>
    %24 = math.log %22 : vector<40x1xf32>
    %25 = arith.subf %23, %24 : vector<40x1xf32>
    %cst_10 = arith.constant -16.1180954 : f32
    %cst_11 = arith.constant -1.00000008E-7 : f32
    %26 = vector.broadcast %cst_10 : f32 to vector<40x1xf32>
    %27 = arith.maximumf %26, %25 : vector<40x1xf32>
    %28 = vector.broadcast %cst_11 : f32 to vector<40x1xf32>
    %29 = arith.minimumf %28, %27 : vector<40x1xf32>
    %30 = math.exp %29 : vector<40x1xf32>
    %cst_12 = arith.constant 1.000000e+00 : f32
    %31 = vector.broadcast %cst_12 : f32 to vector<40x1xf32>
    %32 = arith.subf %31, %30 : vector<40x1xf32>
    %33 = arith.mulf %32, %32 : vector<40x1xf32>
    %cst_13 = arith.constant 0.000000e+00 : f32
    %34 = vector.broadcast %cst_13 : f32 to vector<40x1xf32>
    %35 = arith.subf %34, %29 : vector<40x1xf32>
    %36 = arith.mulf %35, %33 : vector<40x1xf32>
    %37 = arith.mulf %36, %17 : vector<40x1xf32>
    %38 = tpu.iota {dimensions = array<i32: 0>} : vector<40x1xi32>
    %c40_i32 = arith.constant 40 : i32
    %39 = arith.muli %arg0, %c40_i32 : i32
    %40 = vector.broadcast %39 : i32 to vector<40x1xi32>
    %41 = arith.addi %40, %38 : vector<40x1xi32>
    %c40_i32_14 = arith.constant 40 : i32
    %42 = vector.broadcast %c40_i32_14 : i32 to vector<40x1xi32>
    %43 = arith.cmpi slt, %41, %42 : vector<40x1xi32>
    %cst_15 = arith.constant 0.000000e+00 : f32
    %44 = vector.broadcast %cst_15 : f32 to vector<40x1xf32>
    %45 = arith.select %43, %37, %44 : vector<40x1xi1>, vector<40x1xf32>
    %46 = vector.shape_cast %45 : vector<40x1xf32> to vector<1x40x1xf32>
    %cst_16 = arith.constant dense<0.000000e+00> : vector<1xf32>
    %47 = vector.multi_reduction <add>, %46, %cst_16 [1, 2] : vector<1x40x1xf32> to vector<1xf32>
    %48 = vector.shape_cast %47 : vector<1xf32> to vector<1x1x1xf32>
    %49 = vector.extract %48[0, 0, 0] : f32 from vector<1x1x1xf32>
    %50 = tpu.iota {dimensions = array<i32: 1>} : vector<1x128xi32>
    %c0_i32 = arith.constant 0 : i32
    %51 = vector.broadcast %c0_i32 : i32 to vector<1x128xi32>
    %52 = arith.cmpi eq, %50, %51 : vector<1x128xi32>
    %cst_17 = arith.constant 0.000000e+00 : f32
    %53 = vector.broadcast %49 : f32 to vector<1x128xf32>
    %54 = vector.broadcast %cst_17 : f32 to vector<1x128xf32>
    %55 = arith.select %52, %53, %54 : vector<1x128xi1>, vector<1x128xf32>
    %c0_18 = arith.constant 0 : index
    %c0_19 = arith.constant 0 : index
    %56 = vector.load %arg4[%c0_18, %c0_19] : memref<1x128xf32, #tpu.memory_space<vmem>>, vector<1x128xf32>
    tpu.vector_store %arg4[%c0_18, %c0_19], %55 {strides = array<i32>} : memref<1x128xf32, #tpu.memory_space<vmem>>, vector<1x128xf32>,
    return
  }
  func.func @transform_0(%arg0: i32) -> (i32, i32) {
    %c0_i32 = arith.constant 0 : i32
    %c0_i32_0 = arith.constant 0 : i32
    return %arg0, %c0_i32 : i32, i32
  }
  func.func @transform_1(%arg0: i32) -> (i32, i32) {
    %c0_i32 = arith.constant 0 : i32
    %c0_i32_0 = arith.constant 0 : i32
    return %arg0, %c0_i32 : i32, i32
  }
  func.func @transform_2(%arg0: i32) -> (i32, i32) {
    %c0_i32 = arith.constant 0 : i32
    %c0_i32_0 = arith.constant 0 : i32
    %c0_i32_1 = arith.constant 0 : i32
    return %c0_i32, %c0_i32_0 : i32, i32
  }
  func.func @transform_3(%arg0: i32) -> (i32, i32) {
    %c0_i32 = arith.constant 0 : i32
    %c0_i32_0 = arith.constant 0 : i32
    return %c0_i32, %arg0 : i32, i32
  }
}

</mosaic_0001>

<bundles_post_ra>
// kernel: tpu_custom_call.1
= control target key start
LH: loop header
LB: loop body
LE: loop exit
PB: predicated region body
PF: predicated region fallthrough
CT: control target
= control target key end

     0   :  { %vm48_vm0 = vcmask 130048   ;;  %v328_v6 = vmov 0   ;;  %s465_s0 = inlined_call_operand.vmem [shape: f32[40,16], index: 0, kind: input, shape index: {}]   ;;  %s466_s1 = inlined_call_operand.vmem [shape: s32[40,1], index: 1, kind: input, shape index: {}]   ;;  %s467_s2 = inlined_call_operand.vmem [shape: f32[1,16], index: 2, kind: input, shape index: {}]   ;;  %s468_s3 = inlined_call_operand.hbm [shape: f32[1,128], index: 3, kind: output, shape index: {}]  }
   0x1   :  { %v353_v0 = vld [vmem:[%s465_s0 + $0x20] sm:$0xff]  ;;  %v358_v1 = vld [vmem:[%s465_s0 + $0x10] sm:$0xff]  ;;  %269 = vset.pattern.permute.xlu0 %v328_v6  ;;  %270 = vset.pattern.permute.xlu1 %v328_v6 }
   0x2   :  { %v15_v2 = vld [vmem:[%s465_s0] sm:$0xff]  ;;  %v61_v3 = vsel %vm48_vm0, %v353_v0, -inf  ;;  %v55_v4 = vsel %vm48_vm0, %v358_v1, -inf  ;;  %268 = vset.pattern.permute.xlu2 %v328_v6 }
   0x3   :  { %v49_v5 = vsel %vm48_vm0, %v15_v2, -inf  ;;  %62 = vmax.xlane.f32.xlu2 %v61_v3  ;;  %56 = vmax.xlane.f32.xlu1 %v55_v4 }
   0x4   :  { %50 = vmax.xlane.f32.xlu0 %v49_v5 }
   0x5   :  { %8 = vsyncpa [#allocation3], 0  ;;  %v18_v7 = vld [vmem:[%s465_s0 + $0x18] sm:$0xff]  ;;  %v16_v8 = vld [vmem:[%s465_s0 + $0x8] sm:$0xff]  ;;  %v26_v20 = vlaneseq  ;;  %vm225_vm6 = vcmask 7168   ;;  %s255_s8 = sshll.u32 %s468_s3, 4  ;;  %s256_s8 = int_to_ptr.hbm [resolvable:$true] %s255_s8 }
   0x6   :  { %v58_v9 = vsel %vm48_vm0, %v18_v7, -inf  ;;  %v52_v10 = vsel %vm48_vm0, %v16_v8, -inf  ;;  %v20_v11 = vld [vmem:[%s466_s1] sm:$0xff]  ;;  %v21_v12 = vld [vmem:[%s466_s1 + $0x8] sm:$0xff]  ;;  %v23_v13 = vld [vmem:[%s466_s1 + $0x18] sm:$0xff] }
   0x7   :  { %v22_v14 = vld [vmem:[%s466_s1 + $0x10] sm:$0xff]  ;;  %v24_v15 = vld [vmem:[%s466_s1 + $0x20] sm:$0xff]  ;;  %v400_v23 = vand.u32 127, %v26_v20 }
   0x8   :  { %v271_v52 = vld [vmem:[%s467_s2] ss:$0 sm:$0xff]  ;;  %s329_s2 = smov [#allocation2]  }
   0x9   :  { %s253_s5 = sshll.u32 %s329_s2, 4  ;;  %vm244_vm7 = vcmp.eq.s32.totalorder %v400_v23, 0  ;;  %s254_s5 = int_to_ptr.vmem [resolvable:$true] %s253_s5 }
   0xb   :  { %59 = vmax.xlane.f32.xlu1 %v58_v9 }
   0xc   :  { %53 = vmax.xlane.f32.xlu0 %v52_v10 }
  0x1b   :  { %29 = vperm.xlu2 %268, %v20_v11  }
  0x20   :  { %32 = vperm.xlu0 %269, %v21_v12  }
  0x23   :  { %38 = vperm.xlu2 %268, %v23_v13  }
  0x24   :  { %35 = vperm.xlu1 %270, %v22_v14  }
  0x2b   :  { %41 = vperm.xlu2 %268, %v24_v15  }
  0x76   :  { %v391_v16 = vpop.xlane.xlu2 %62  ;;  %v393_v17 = vpop.xlane.xlu1 %56 }
  0x77   :  { %v395_v18 = vpop.xlane.xlu0 %50  ;;  %v109_v19 = vsub.f32 %v358_v1, %v393_v17  ;;  %v111_v42 = vsub.f32 %v353_v0, %v391_v16 }
  0x78   :  { %v107_v21 = vsub.f32 %v15_v2, %v395_v18 }
  0x79   :  { %v116_v22 = vmul.f32 1.442695, %v109_v19  ;;  %v120_v47 = vmul.f32 1.442695, %v111_v42 }
  0x7a   :  { %v112_v24 = vmul.f32 1.442695, %v107_v21 }
  0x7b   :  { %272 = vpow2.f32 %v116_v22 }
  0x7c   :  { %274 = vpow2.f32 %v112_v24 }
  0x7e   :  { %v30_v25 = vpop.permute.xlu2 %29  ;;  %v402_v26 = vpop.xlane.xlu1 %59 }
  0x7f   :  { %vm43_vm1 = vcmp.eq.s32.totalorder %v400_v23, %v30_v25  ;;  %v110_v27 = vsub.f32 %v18_v7, %v402_v26  ;;  %v410_v34 = vpop.xlane.xlu0 %53 }
  0x80   :  { %v64_v28 = vsel %vm43_vm1, %v15_v2, 0.0  ;;  %v108_v37 = vsub.f32 %v16_v8, %v410_v34  ;;  %v87_v54 = vsel %vm43_vm1, %v271_v52, 0.0 }
  0x81   :  { %v69_v29 = vsel %vm48_vm0, %v64_v28, 0.0  ;;  %v118_v30 = vmul.f32 1.442695, %v110_v27  ;;  %v273_v31 = vpop.eup %272  ;;  %v92_v57 = vsel %vm48_vm0, %v87_v54, 0.0 }
  0x82   :  { %70 = vadd.xlane.f32.xlu1 %v69_v29  ;;  %v128_v32 = vsel %vm48_vm0, %v273_v31, 0.0  ;;  %v275_v33 = vpop.eup %274  ;;  %v114_v39 = vmul.f32 1.442695, %v108_v37 }
  0x83   :  { %129 = vadd.xlane.f32.xlu0 %v128_v32  ;;  %276 = vpow2.f32 %v118_v30  ;;  %v122_v35 = vsel %vm48_vm0, %v275_v33, 0.0 }
  0x84   :  { %278 = vpow2.f32 %v114_v39 }
  0x85   :  { %280 = vpow2.f32 %v120_v47 }
  0x86   :  { %v39_v40 = vpop.permute.xlu2 %38 }
  0x87   :  { %vm46_vm2 = vcmp.eq.s32.totalorder %v400_v23, %v39_v40 }
  0x88   :  { %v67_v46 = vsel %vm46_vm2, %v18_v7, 0.0  ;;  %v90_v61 = vsel %vm46_vm2, %v271_v52, 0.0 }
  0x89   :  { %v277_v36 = vpop.eup %276  ;;  %v78_v50 = vsel %vm48_vm0, %v67_v46, 0.0  ;;  %v101_v63 = vsel %vm48_vm0, %v90_v61, 0.0 }
  0x8a   :  { %123 = vadd.xlane.f32.xlu1 %v122_v35  ;;  %v131_v38 = vsel %vm48_vm0, %v277_v36, 0.0  ;;  %v279_v51 = vpop.eup %278 }
  0x8b   :  { %v125_v53 = vsel %vm48_vm0, %v279_v51, 0.0  ;;  %v281_v59 = vpop.eup %280 }
  0x8c   :  { %v134_v60 = vsel %vm48_vm0, %v281_v59, 0.0 }
  0x8e   :  { %v42_v56 = vpop.permute.xlu2 %41 }
  0x8f   :  { %vm47_vm5 = vcmp.eq.s32.totalorder %v400_v23, %v42_v56 }
  0x90   :  { %v91_v62 = vsel %vm47_vm5, %v271_v52, 0.0  ;;  %v68_v2 = vsel %vm47_vm5, %v353_v0, 0.0 }
  0x91   :  { %v81_v3 = vsel %vm48_vm0, %v68_v2, 0.0 }
  0x92   :  { %v33_v41 = vpop.permute.xlu0 %32  ;;  %132 = vadd.xlane.f32.xlu1 %v131_v38 }
  0x93   :  { %vm44_vm3 = vcmp.eq.s32.totalorder %v400_v23, %v33_v41 }
  0x94   :  { %v65_v43 = vsel %vm44_vm3, %v16_v8, 0.0  ;;  %v88_v55 = vsel %vm44_vm3, %v271_v52, 0.0 }
  0x95   :  { %v72_v44 = vsel %vm48_vm0, %v65_v43, 0.0  ;;  %v95_v58 = vsel %vm48_vm0, %v88_v55, 0.0 }
  0x96   :  { %73 = vadd.xlane.f32.xlu2 %v72_v44  ;;  %v36_v45 = vpop.permute.xlu1 %35 }
  0x97   :  { %vm45_vm4 = vcmp.eq.s32.totalorder %v400_v23, %v36_v45 }
  0x98   :  { %v66_v48 = vsel %vm45_vm4, %v358_v1, 0.0  ;;  %v104_v1 = vsel %vm48_vm0, %v91_v62, 0.0  ;;  %v89_v4 = vsel %vm45_vm4, %v271_v52, 0.0 }
  0x99   :  { %v75_v49 = vsel %vm48_vm0, %v66_v48, 0.0  ;;  %v98_v5 = vsel %vm48_vm0, %v89_v4, 0.0 }
  0x9a   :  { %76 = vadd.xlane.f32.xlu0 %v75_v49  ;;  %79 = vadd.xlane.f32.xlu1 %v78_v50 }
  0x9e   :  { %126 = vadd.xlane.f32.xlu2 %v125_v53 }
  0xa2   :  { %93 = vadd.xlane.f32.xlu0 %v92_v57  ;;  %96 = vadd.xlane.f32.xlu1 %v95_v58 }
  0xa6   :  { %135 = vadd.xlane.f32.xlu2 %v134_v60 }
  0xaa   :  { %102 = vadd.xlane.f32.xlu0 %v101_v63  ;;  %105 = vadd.xlane.f32.xlu1 %v104_v1 }
  0xae   :  { %82 = vadd.xlane.f32.xlu2 %v81_v3 }
  0xb6   :  { %99 = vadd.xlane.f32.xlu2 %v98_v5 }
  0xf5   :  { %v71_v6 = vpop.xlane.xlu1 %70 }
  0xf6   :  { %v130_v8 = vpop.xlane.xlu0 %129  ;;  %v137_v0 = vsub.f32 %v71_v6, %v395_v18 }
  0xfd   :  { %v124_v7 = vpop.xlane.xlu1 %123 }
  0xfe   :  { %282 = vlog2.f32 %v124_v7 }
  0xff   :  { %284 = vlog2.f32 %v130_v8 }
 0x104   :  { %v283_v9 = vpop.eup %282 }
 0x105   :  { %v143_v10 = vmul.f32 0.6931472, %v283_v9  ;;  %v133_v11 = vpop.xlane.xlu1 %132  ;;  %v285_v12 = vpop.eup %284 }
 0x106   :  { %286 = vlog2.f32 %v133_v11  ;;  %v147_v19 = vmul.f32 0.6931472, %v285_v12 }
 0x107   :  { %v152_v13 = vsub.f32 %v137_v0, %v143_v10 }
 0x109   :  { %v74_v14 = vpop.xlane.xlu2 %73  ;;  %v157_v20 = vmax.f32 %v152_v13, -16.118095 }
 0x10a   :  { %v138_v38 = vsub.f32 %v74_v14, %v410_v34 }
 0x10b   :  { %v162_v30 = vmin.f32 %v157_v20, -1.0000001e-07 }
 0x10c   :  { %v287_v15 = vpop.eup %286 }
 0x10d   :  { %v149_v21 = vmul.f32 0.6931472, %v287_v15  ;;  %v80_v22 = vpop.xlane.xlu1 %79  ;;  %v77_v24 = vpop.xlane.xlu0 %76  ;;  %v167_v33 = vmul.f32 1.442695, %v162_v30  ;;  %v187_v56 = vsub.f32 0.0, %v162_v30 }
 0x10e   :  { %v140_v25 = vsub.f32 %v80_v22, %v402_v26  ;;  %v139_v27 = vsub.f32 %v77_v24, %v393_v17 }
 0x110   :  { %v155_v28 = vsub.f32 %v140_v25, %v149_v21  ;;  %v154_v29 = vsub.f32 %v139_v27, %v147_v19 }
 0x111   :  { %v127_v31 = vpop.xlane.xlu2 %126 }
 0x112   :  { %v159_v32 = vmax.f32 %v154_v29, -16.118095  ;;  %288 = vlog2.f32 %v127_v31  ;;  %v160_v18 = vmax.f32 %v155_v28, -16.118095 }
 0x113   :  { %290 = vpow2.f32 %v167_v33 }
 0x114   :  { %v164_v35 = vmin.f32 %v159_v32, -1.0000001e-07  ;;  %v165_v37 = vmin.f32 %v160_v18, -1.0000001e-07 }
 0x115   :  { %v94_v62 = vpop.xlane.xlu0 %93  ;;  %v97_v5 = vpop.xlane.xlu1 %96 }
 0x116   :  { %v171_v41 = vmul.f32 1.442695, %v164_v35  ;;  %v173_v17 = vmul.f32 1.442695, %v165_v37  ;;  %v189_v4 = vsub.f32 0.0, %v164_v35  ;;  %v190_v9 = vsub.f32 0.0, %v165_v37 }
 0x118   :  { %v289_v36 = vpop.eup %288 }
 0x119   :  { %v145_v39 = vmul.f32 0.6931472, %v289_v36  ;;  %v136_v40 = vpop.xlane.xlu2 %135  ;;  %v291_v43 = vpop.eup %290 }
 0x11a   :  { %292 = vlog2.f32 %v136_v40  ;;  %v177_v49 = vsub.f32 1.0, %v291_v43 }
 0x11b   :  { %v153_v26 = vsub.f32 %v138_v38, %v145_v39  ;;  %294 = vpow2.f32 %v171_v41 }
 0x11c   :  { %296 = vpow2.f32 %v173_v17  ;;  %v182_v53 = vmul.f32 %v177_v49, %v177_v49 }
 0x11d   :  { %v158_v42 = vmax.f32 %v153_v26, -16.118095  ;;  %v103_v21 = vpop.xlane.xlu0 %102  ;;  %v106_v30 = vpop.xlane.xlu1 %105 }
 0x11e   :  { %v192_v61 = vmul.f32 %v187_v56, %v182_v53 }
 0x11f   :  { %v163_v44 = vmin.f32 %v158_v42, -1.0000001e-07 }
 0x120   :  { %v293_v45 = vpop.eup %292  ;;  %v197_v7 = vmul.f32 %v192_v61, %v94_v62 }
 0x121   :  { %v169_v46 = vmul.f32 1.442695, %v163_v44  ;;  %v151_v47 = vmul.f32 0.6931472, %v293_v45  ;;  %v83_v48 = vpop.xlane.xlu2 %82  ;;  %v295_v34 = vpop.eup %294  ;;  %v188_v3 = vsub.f32 0.0, %v163_v44 }
 0x122   :  { %v141_v50 = vsub.f32 %v83_v48, %v391_v16  ;;  %v297_v52 = vpop.eup %296  ;;  %v179_v55 = vsub.f32 1.0, %v295_v34  ;;  %v226_v15 = vsel %vm225_vm6, %v197_v7, 0.0 }
 0x123   :  { %298 = vpow2.f32 %v169_v46  ;;  %v180_v59 = vsub.f32 1.0, %v297_v52 }
 0x124   :  { %v156_v51 = vsub.f32 %v141_v50, %v151_v47  ;;  %v184_v1 = vmul.f32 %v179_v55, %v179_v55 }
 0x125   :  { %v185_v16 = vmul.f32 %v180_v59, %v180_v59 }
 0x126   :  { %v161_v54 = vmax.f32 %v156_v51, -16.118095  ;;  %v194_v10 = vmul.f32 %v189_v4, %v184_v1 }
 0x127   :  { %v195_v0 = vmul.f32 %v190_v9, %v185_v16 }
 0x128   :  { %v166_v57 = vmin.f32 %v161_v54, -1.0000001e-07 }
 0x129   :  { %v299_v58 = vpop.eup %298  ;;  %v100_v8 = vpop.xlane.xlu2 %99  ;;  %v200_v22 = vmul.f32 %v195_v0, %v103_v21 }
 0x12a   :  { %v178_v60 = vsub.f32 1.0, %v299_v58  ;;  %v175_v63 = vmul.f32 1.442695, %v166_v57  ;;  %v199_v12 = vmul.f32 %v194_v10, %v100_v8  ;;  %v191_v25 = vsub.f32 0.0, %v166_v57 }
 0x12b   :  { %v231_v31 = vsel %vm225_vm6, %v200_v22, 0.0 }
 0x12c   :  { %v183_v2 = vmul.f32 %v178_v60, %v178_v60  ;;  %300 = vpow2.f32 %v175_v63  ;;  %v229_v27 = vsel %vm225_vm6, %v199_v12, 0.0 }
 0x12e   :  { %v193_v6 = vmul.f32 %v188_v3, %v183_v2 }
 0x130   :  { %v198_v11 = vmul.f32 %v193_v6, %v97_v5 }
 0x132   :  { %v301_v13 = vpop.eup %300  ;;  %v227_v14 = vsel %vm225_vm6, %v198_v11, 0.0 }
 0x133   :  { %v228_v19 = vadd.f32 %v227_v14, %v226_v15  ;;  %v181_v20 = vsub.f32 1.0, %v301_v13 }
 0x135   :  { %v186_v24 = vmul.f32 %v181_v20, %v181_v20  ;;  %v230_v28 = vadd.f32 %v229_v27, %v228_v19 }
 0x137   :  { %v196_v29 = vmul.f32 %v191_v25, %v186_v24  ;;  %v232_v18 = vadd.f32 %v231_v31, %v230_v28 }
 0x139   :  { %v201_v32 = vmul.f32 %v196_v29, %v106_v30 }
 0x13b   :  { %v233_v33 = vsel %vm225_vm6, %v201_v32, 0.0 }
 0x13c   :  { %v234_v35 = vadd.f32 %v233_v33, %v232_v18 }
 0x13e   :  { %235 = vadd.xlane.f32.xlu2 %v234_v35 }
 0x1b1   :  { %v236_v36 = vpop.xlane.xlu2 %235 }
 0x1b2   :  { %v237_v37 = vrot.slane %v236_v36, 4 }
 0x1b4   :  { %v238_v38 = vadd.f32 %v237_v37, %v236_v36 }
 0x1b6   :  { %v239_v39 = vrot.slane %v238_v38, 2 }
 0x1b8   :  { %v240_v40 = vadd.f32 %v239_v39, %v238_v38 }
 0x1ba   :  { %v241_v41 = vrot.slane %v240_v40, 1 }
 0x1bc   :  { %v242_v26 = vadd.f32 %v241_v41, %v240_v40 }
 0x1be   :  { %264 = vpush %v242_v26 }
 0x1ef   :  { %s265_s9 = spop %264 }
 0x1f0   :  { %v245_v17 = vstv %s265_s9 }
 0x1f1   :  { %v246_v42 = vsel %vm244_vm7, %v245_v17, 0.0 }
 0x1f2   :  { %247 = vst [vmem:[#allocation2] sm:$0x1] %v246_v42 }
 0x1f3   :  { %258 = dma.vmem_to_hbm [thread:$0]  %s254_s5, 16, %s256_s8, [#allocation3]  }
 0x1f4   :  { %326 = dma.done.wait [#allocation3], 16  }
 0x1f5   :  { %327 = vsyncadd [#allocation3], 4294967280 }
 0x1f6   :  { %263 = vsyncpa [#allocation3], 1 }

</bundles_post_ra>
